<compile_context>
chip_gen: v6e
topology: v6e:2x2x1
jax: 0.10.0
libtpu: 0.0.40
codegen_flags: <defaults>
</compile_context>

<pallas_src>
import jax
import jax.numpy as jnp
from jax.experimental import pallas as pl
from jax.experimental.pallas import tpu as pltpu

EPS = 1e-5


def _make_ibn_kernel(n, hw):
    inv_hw = 1.0 / float(hw)
    inv_nhw = 1.0 / float(n * hw)

    def kernel(x_ref, g_ref, b_ref, m_ref, o_ref):
        x = x_ref[...]
        if x.dtype != jnp.float32:           # only upcast when input is not f32
            x = x.astype(jnp.float32)

        # One-pass statistics along the lane (HW) axis.
        s1 = jnp.sum(x, axis=2, keepdims=True)        # (N, ct, 1)
        s2 = jnp.sum(x * x, axis=2, keepdims=True)    # (N, ct, 1)

        # InstanceNorm statistics: per (n, c).
        mean_in = s1 * inv_hw
        var_in = s2 * inv_hw - mean_in * mean_in

        # BatchNorm statistics: per channel (also reduce over the batch axis).
        s1_b = jnp.sum(s1, axis=0, keepdims=True)     # (1, ct, 1)
        s2_b = jnp.sum(s2, axis=0, keepdims=True)     # (1, ct, 1)
        mean_bn = s1_b * inv_nhw
        var_bn = s2_b * inv_nhw - mean_bn * mean_bn

        # Per-channel branch select: mask==1 -> BN, mask==0 -> IN.
        is_bn = m_ref[...] > 0.5                      # (1, ct, 1)
        mean = jnp.where(is_bn, mean_bn, mean_in)     # -> (N, ct, 1)
        var = jnp.maximum(jnp.where(is_bn, var_bn, var_in), 0.0)
        inv = jax.lax.rsqrt(var + EPS)

        g = g_ref[...]
        b = b_ref[...]
        if g.dtype != jnp.float32:
            g = g.astype(jnp.float32)
        if b.dtype != jnp.float32:
            b = b.astype(jnp.float32)

        # Single elementwise normalize + affine pass.
        o_ref[...] = ((x - mean) * (inv * g) + b).astype(o_ref.dtype)

    return kernel


def _choose_c_tile(n, c, hw, tile_budget_bytes=16 * 1024 * 1024):
    """Largest channel tile (multiple of 8, dividing C) whose in+out blocks,
    double-buffered in f32, fit the per-step tile budget."""
    if c % 8 != 0:
        return c  # small / odd C: full-channel block is allowed by BlockSpec
    bytes_per_channel = 2 * 2 * n * hw * 4    # (in + out) x double-buffer x f32
    max_tile = max(8, (tile_budget_bytes // max(bytes_per_channel, 1)) // 8 * 8)
    c_tile = min(c, max_tile)
    while c % c_tile != 0:
        c_tile -= 8
    return max(c_tile, 8)


def ibn_forward(x, params, ratio=0.5):
    """x: (N, C, H, W) float32, NCHW. Returns (N, C, H, W)."""
    N, C, H, W = x.shape
    half = int(C * (1.0 - ratio))       # BN channels (matches PyTorch IBN split)
    ci = C - half                       # IN channels
    HW = H * W

    x3 = x.reshape(N, C, HW)            # contiguous reshape, no data movement

    # Tiny per-channel parameter vectors, laid out once in full-channel order.
    gamma = jnp.concatenate(
        [params["bn_gamma"].astype(jnp.float32), params["in_gamma"].astype(jnp.float32)]
    ).reshape(1, C, 1)
    beta = jnp.concatenate(
        [params["bn_beta"].astype(jnp.float32), params["in_beta"].astype(jnp.float32)]
    ).reshape(1, C, 1)
    bn_mask = jnp.concatenate(
        [jnp.ones((half,), jnp.float32), jnp.zeros((ci,), jnp.float32)]
    ).reshape(1, C, 1)

    c_tile = _choose_c_tile(N, C, HW)
    grid = (C // c_tile,)

    x_spec = pl.BlockSpec((N, c_tile, HW), lambda c: (0, c, 0))
    prm_spec = pl.BlockSpec((1, c_tile, 1), lambda c: (0, c, 0))

    out = pl.pallas_call(
        _make_ibn_kernel(N, HW),
        out_shape=jax.ShapeDtypeStruct((N, C, HW), x.dtype),
        grid=grid,
        in_specs=[x_spec, prm_spec, prm_spec, prm_spec],
        out_specs=x_spec,
        compiler_params=pltpu.CompilerParams(
            dimension_semantics=("parallel",),
            vmem_limit_bytes=32 * 1024 * 1024,
        ),
    )(x3, gamma, beta, bn_mask)

    return out.reshape(N, C, H, W)


def ibn_reference(x, params, ratio=0.5):
    """Pure-JAX reference mirroring the PyTorch forward (training-mode BN)."""
    N, C, H, W = x.shape
    half = int(C * (1.0 - ratio))
    ci = C - half
    xb, xi = x[:, :half], x[:, half:]

    mb = jnp.mean(xb, axis=(0, 2, 3), keepdims=True)
    vb = jnp.mean((xb - mb) ** 2, axis=(0, 2, 3), keepdims=True)
    ob = (xb - mb) / jnp.sqrt(vb + EPS)
    ob = ob * params["bn_gamma"].reshape(1, half, 1, 1) + params["bn_beta"].reshape(1, half, 1, 1)

    mi = jnp.mean(xi, axis=(2, 3), keepdims=True)
    vi = jnp.mean((xi - mi) ** 2, axis=(2, 3), keepdims=True)
    oi = (xi - mi) / jnp.sqrt(vi + EPS)
    oi = oi * params["in_gamma"].reshape(1, ci, 1, 1) + params["in_beta"].reshape(1, ci, 1, 1)

    return jnp.concatenate([ob, oi], axis=1)


if __name__ == "__main__":
    key = jax.random.PRNGKey(0)
    N, C, H, W = 2, 4, 16, 16          # planes=4, ratio=0.5 -> half=2, IN channels=2
    ratio = 0.5
    half = int(C * (1.0 - ratio))
    ci = C - half

    kx, k1, k2, k3, k4 = jax.random.split(key, 5)
    x = jax.random.normal(kx, (N, C, H, W), dtype=jnp.float32)

    # PyTorch defaults are gamma=1, beta=0; use random values so the affine
    # path is actually exercised.
    params = {
        "bn_gamma": 1.0 + 0.1 * jax.random.normal(k1, (half,), dtype=jnp.float32),
        "bn_beta": 0.1 * jax.random.normal(k2, (half,), dtype=jnp.float32),
        "in_gamma": 1.0 + 0.1 * jax.random.normal(k3, (ci,), dtype=jnp.float32),
        "in_beta": 0.1 * jax.random.normal(k4, (ci,), dtype=jnp.float32),
    }

    out = jax.block_until_ready(ibn_forward(x, params, ratio))
    ref = ibn_reference(x, params, ratio)

    assert out.shape == (N, C, H, W)
    assert jnp.allclose(out, ref, atol=1e-4, rtol=1e-4), float(jnp.max(jnp.abs(out - ref)))

    print("KERNEL_OK")
</pallas_src>

<mosaic_0001>
module attributes {stable_mosaic.version = 11 : i64} {
  func.func @kernel(%arg0: i32, %arg1: memref<2x4x256xf32, #tpu.memory_space<vmem>>, %arg2: memref<1x4x1xf32, #tpu.memory_space<vmem>>, %arg3: memref<1x4x1xf32, #tpu.memory_space<vmem>>, %arg4: memref<1x4x1xf32, #tpu.memory_space<vmem>>, %arg5: memref<2x4x256xf32, #tpu.memory_space<vmem>>) attributes {dimension_semantics = [#tpu.dimension_semantics<parallel>], iteration_bounds = array<i64: 1>, scalar_prefetch = 0 : i64, scratch_operands = 0 : i64, tpu.core_type = #tpu.core_type<tc>, window_params = [{transform_indices = @transform_0, window_bounds = array<i64: 2, 4, 256>}, {transform_indices = @transform_1, window_bounds = array<i64: 1, 4, 1>}, {transform_indices = @transform_2, window_bounds = array<i64: 1, 4, 1>}, {transform_indices = @transform_3, window_bounds = array<i64: 1, 4, 1>}, {transform_indices = @transform_4, window_bounds = array<i64: 2, 4, 256>}]} {
    %c0 = arith.constant 0 : index
    %c0_0 = arith.constant 0 : index
    %c0_1 = arith.constant 0 : index
    %0 = vector.load %arg1[%c0, %c0_0, %c0_1] : memref<2x4x256xf32, #tpu.memory_space<vmem>>, vector<2x4x256xf32>
    %cst = arith.constant dense<0.000000e+00> : vector<2x4xf32>
    %1 = vector.multi_reduction <add>, %0, %cst [2] : vector<2x4x256xf32> to vector<2x4xf32>
    %2 = vector.shape_cast %1 : vector<2x4xf32> to vector<2x4x1xf32>
    %3 = arith.mulf %0, %0 : vector<2x4x256xf32>
    %cst_2 = arith.constant dense<0.000000e+00> : vector<2x4xf32>
    %4 = vector.multi_reduction <add>, %3, %cst_2 [2] : vector<2x4x256xf32> to vector<2x4xf32>
    %5 = vector.shape_cast %4 : vector<2x4xf32> to vector<2x4x1xf32>
    %cst_3 = arith.constant 3.906250e-03 : f32
    %6 = vector.broadcast %cst_3 : f32 to vector<2x4x1xf32>
    %7 = arith.mulf %2, %6 : vector<2x4x1xf32>
    %cst_4 = arith.constant 3.906250e-03 : f32
    %8 = vector.broadcast %cst_4 : f32 to vector<2x4x1xf32>
    %9 = arith.mulf %5, %8 : vector<2x4x1xf32>
    %10 = arith.mulf %7, %7 : vector<2x4x1xf32>
    %11 = arith.subf %9, %10 : vector<2x4x1xf32>
    %cst_5 = arith.constant dense<0.000000e+00> : vector<4x1xf32>
    %12 = vector.multi_reduction <add>, %2, %cst_5 [0] : vector<2x4x1xf32> to vector<4x1xf32>
    %13 = vector.shape_cast %12 : vector<4x1xf32> to vector<1x4x1xf32>
    %cst_6 = arith.constant dense<0.000000e+00> : vector<4x1xf32>
    %14 = vector.multi_reduction <add>, %5, %cst_6 [0] : vector<2x4x1xf32> to vector<4x1xf32>
    %15 = vector.shape_cast %14 : vector<4x1xf32> to vector<1x4x1xf32>
    %cst_7 = arith.constant 0.001953125 : f32
    %16 = vector.broadcast %cst_7 : f32 to vector<1x4x1xf32>
    %17 = arith.mulf %13, %16 : vector<1x4x1xf32>
    %cst_8 = arith.constant 0.001953125 : f32
    %18 = vector.broadcast %cst_8 : f32 to vector<1x4x1xf32>
    %19 = arith.mulf %15, %18 : vector<1x4x1xf32>
    %20 = arith.mulf %17, %17 : vector<1x4x1xf32>
    %21 = arith.subf %19, %20 : vector<1x4x1xf32>
    %c0_9 = arith.constant 0 : index
    %c0_10 = arith.constant 0 : index
    %c0_11 = arith.constant 0 : index
    %22 = vector.load %arg4[%c0_9, %c0_10, %c0_11] : memref<1x4x1xf32, #tpu.memory_space<vmem>>, vector<1x4x1xf32>
    %cst_12 = arith.constant 5.000000e-01 : f32
    %23 = vector.broadcast %cst_12 : f32 to vector<1x4x1xf32>
    %24 = arith.cmpf ogt, %22, %23 : vector<1x4x1xf32>
    %25 = vector.shape_cast %24 : vector<1x4x1xi1> to vector<1x4x1xi1>
    %26 = vector.broadcast %25 : vector<1x4x1xi1> to vector<2x4x1xi1>
    %27 = vector.shape_cast %17 : vector<1x4x1xf32> to vector<1x4x1xf32>
    %28 = vector.broadcast %27 : vector<1x4x1xf32> to vector<2x4x1xf32>
    %29 = arith.select %26, %28, %7 : vector<2x4x1xi1>, vector<2x4x1xf32>
    %30 = vector.shape_cast %24 : vector<1x4x1xi1> to vector<1x4x1xi1>
    %31 = vector.broadcast %30 : vector<1x4x1xi1> to vector<2x4x1xi1>
    %32 = vector.shape_cast %21 : vector<1x4x1xf32> to vector<1x4x1xf32>
    %33 = vector.broadcast %32 : vector<1x4x1xf32> to vector<2x4x1xf32>
    %34 = arith.select %31, %33, %11 : vector<2x4x1xi1>, vector<2x4x1xf32>
    %cst_13 = arith.constant 0.000000e+00 : f32
    %35 = vector.broadcast %cst_13 : f32 to vector<2x4x1xf32>
    %36 = arith.maximumf %34, %35 : vector<2x4x1xf32>
    %cst_14 = arith.constant 9.99999974E-6 : f32
    %37 = vector.broadcast %cst_14 : f32 to vector<2x4x1xf32>
    %38 = arith.addf %36, %37 : vector<2x4x1xf32>
    %39 = math.rsqrt %38 : vector<2x4x1xf32>
    %c0_15 = arith.constant 0 : index
    %c0_16 = arith.constant 0 : index
    %c0_17 = arith.constant 0 : index
    %40 = vector.load %arg2[%c0_15, %c0_16, %c0_17] : memref<1x4x1xf32, #tpu.memory_space<vmem>>, vector<1x4x1xf32>
    %c0_18 = arith.constant 0 : index
    %c0_19 = arith.constant 0 : index
    %c0_20 = arith.constant 0 : index
    %41 = vector.load %arg3[%c0_18, %c0_19, %c0_20] : memref<1x4x1xf32, #tpu.memory_space<vmem>>, vector<1x4x1xf32>
    %42 = vector.broadcast %29 : vector<2x4x1xf32> to vector<2x4x256xf32>
    %43 = arith.subf %0, %42 : vector<2x4x256xf32>
    %44 = vector.broadcast %40 : vector<1x4x1xf32> to vector<2x4x1xf32>
    %45 = arith.mulf %39, %44 : vector<2x4x1xf32>
    %46 = vector.broadcast %45 : vector<2x4x1xf32> to vector<2x4x256xf32>
    %47 = arith.mulf %43, %46 : vector<2x4x256xf32>
    %48 = vector.broadcast %41 : vector<1x4x1xf32> to vector<2x4x256xf32>
    %49 = arith.addf %47, %48 : vector<2x4x256xf32>
    %c0_21 = arith.constant 0 : index
    %c0_22 = arith.constant 0 : index
    %c0_23 = arith.constant 0 : index
    %50 = vector.load %arg5[%c0_21, %c0_22, %c0_23] : memref<2x4x256xf32, #tpu.memory_space<vmem>>, vector<2x4x256xf32>
    tpu.vector_store %arg5[%c0_21, %c0_22, %c0_23], %49 {strides = array<i32>} : memref<2x4x256xf32, #tpu.memory_space<vmem>>, vector<2x4x256xf32>,
    return
  }
  func.func @transform_0(%arg0: i32) -> (i32, i32, i32) {
    %c0_i32 = arith.constant 0 : i32
    %c0_i32_0 = arith.constant 0 : i32
    %c0_i32_1 = arith.constant 0 : i32
    return %c0_i32, %arg0, %c0_i32_0 : i32, i32, i32
  }
  func.func @transform_1(%arg0: i32) -> (i32, i32, i32) {
    %c0_i32 = arith.constant 0 : i32
    %c0_i32_0 = arith.constant 0 : i32
    %c0_i32_1 = arith.constant 0 : i32
    return %c0_i32, %arg0, %c0_i32_0 : i32, i32, i32
  }
  func.func @transform_2(%arg0: i32) -> (i32, i32, i32) {
    %c0_i32 = arith.constant 0 : i32
    %c0_i32_0 = arith.constant 0 : i32
    %c0_i32_1 = arith.constant 0 : i32
    return %c0_i32, %arg0, %c0_i32_0 : i32, i32, i32
  }
  func.func @transform_3(%arg0: i32) -> (i32, i32, i32) {
    %c0_i32 = arith.constant 0 : i32
    %c0_i32_0 = arith.constant 0 : i32
    %c0_i32_1 = arith.constant 0 : i32
    return %c0_i32, %arg0, %c0_i32_0 : i32, i32, i32
  }
  func.func @transform_4(%arg0: i32) -> (i32, i32, i32) {
    %c0_i32 = arith.constant 0 : i32
    %c0_i32_0 = arith.constant 0 : i32
    %c0_i32_1 = arith.constant 0 : i32
    return %c0_i32, %arg0, %c0_i32_0 : i32, i32, i32
  }
}

</mosaic_0001>

<bundles_post_ra>
// kernel: tpu_custom_call.1
= control target key start
LH: loop header
LB: loop body
LE: loop exit
PB: predicated region body
PF: predicated region fallthrough
CT: control target
= control target key end

     0   :  { %9 = vsyncpa [#allocation3], 0  ;;  %s332_s0 = inlined_call_operand.hbm [shape: f32[2,4,256], index: 0, kind: input, shape index: {}]   ;;  %s333_s1 = inlined_call_operand.vmem [shape: f32[1,4,1], index: 1, kind: input, shape index: {}]   ;;  %s334_s2 = inlined_call_operand.vmem [shape: f32[1,4,1], index: 2, kind: input, shape index: {}]   ;;  %s335_s3 = inlined_call_operand.vmem [shape: f32[1,4,1], index: 3, kind: input, shape index: {}]   ;;  %s336_s4 = inlined_call_operand.hbm [shape: f32[2,4,256], index: 4, kind: output, shape index: {}]  }
   0x1   :  { %10 = vsyncpa [#allocation4], 0  ;;  %s248_s15 = smov [#allocation2]  }
   0x2   :  { %s16_s16 = sshll.u32 %s248_s15, 4  ;;  %s17_s16 = int_to_ptr.vmem [resolvable:$true] %s16_s16 }
   0x3   :  { %s212_s17 = scalar_lea.vmem %s17_s16, 256  ;;  %p217_p1 = scmp.lt.s32.totalorder %s17_s16, %s17_s16 }
   0x4   :  { %p213_p0 = scmp.ne.s32.totalorder %s17_s16, %s212_s17  ;;  %p218_p2 = scmp.lt.s32.totalorder %s212_s17, %s212_s17 }
   0x6   :  { %p219_p3 = por %p218_p2, %p217_p1 }
   0x8   :  { %p220_p4 = pnand %p219_p3, %p213_p0 }
   0xa   :  { %223 = shalt.err (!%p220_p4)
}
   0xb   :  { %s249_s18 = smov 128   ;;  %s250_s19 = smov 8  }
   0xc   :  { %22 = dma.hbm_to_vmem [thread:$0]  %s332_s0, 256, %s17_s16, [#allocation3], %s249_s18, %s249_s18, %s250_s19  }
   0xd   :  { %244 = dma.done.wait [#allocation3], 256  }
   0xe   :  { %245 = vsyncadd [#allocation3], 4294967040  ;;  %vm40_vm0 = vcmask 1043456   ;;  %v285_v0 = vld [vmem:[#allocation2] sm:$0xff]  ;;  %v287_v1 = vld [vmem:[#allocation2 + $0x8] sm:$0xff]  ;;  %v251_v20 = vmov 0   ;;  %v114_v60 = vlaneseq }
   0xf   :  { %v36_v2 = vcombine.high %v285_v0, %v285_v0  ;;  %v41_v3 = vsel %vm40_vm0, %v285_v0, 0.0  ;;  %v51_v4 = vmul.f32 %v285_v0, %v285_v0  ;;  %v37_v5 = vcombine.high %v287_v1, %v287_v1  ;;  %197 = vset.pattern.permute.xlu1 %v251_v20  ;;  %196 = vset.pattern.permute.xlu0 %v251_v20  ;;  %v87_v24 = vld [vmem:[%s335_s3] sm:$0xf] }
  0x10   :  { %v46_v6 = vsel %vm40_vm0, %v287_v1, 0.0  ;;  %v52_v7 = vmul.f32 %v287_v1, %v287_v1  ;;  %vm88_vm1 = vcmp.gt.f32.partialorder %v87_v24, 0.5  ;;  %v101_v52 = vld [vmem:[%s333_s1] sm:$0xf]  ;;  %v252_v58 = vmov 839922192  }
  0x11   :  { %v42_v8 = vsel %vm40_vm0, %v36_v2, 0.0  ;;  %v55_v9 = vcombine.high %v51_v4, %v51_v4  ;;  %v59_v10 = vsel %vm40_vm0, %v51_v4, 0.0  ;;  %v47_v11 = vsel %vm40_vm0, %v37_v5, 0.0  ;;  %v102_v57 = vld [vmem:[%s334_s2] sm:$0xf]  ;;  %s253_s1 = smov [#allocation5]  }
  0x12   :  { %v43_v12 = vadd.f32 %v42_v8, %v41_v3  ;;  %v56_v13 = vcombine.high %v52_v7, %v52_v7  ;;  %v64_v15 = vsel %vm40_vm0, %v52_v7, 0.0  ;;  %v48_v17 = vadd.f32 %v47_v11, %v46_v6  ;;  %s178_s2 = sshll.u32 %s253_s1, 4  ;;  %s179_s2 = int_to_ptr.vmem [resolvable:$true] %s178_s2 }
  0x13   :  { %v60_v14 = vsel %vm40_vm0, %v55_v9, 0.0  ;;  %v112_v59 = vunpack.c.l.s4 %v252_v58  ;;  %v115_v62 = vshrl.u32 %v114_v60, 7  ;;  %s224_s26 = scalar_lea.vmem %s179_s2, 256  ;;  %p229_p6 = scmp.lt.s32.totalorder %s179_s2, %s179_s2 }
  0x14   :  { %44 = vadd.xlane.f32.xlu0 %v43_v12  ;;  %v61_v16 = vadd.f32 %v60_v14, %v59_v10  ;;  %v65_v18 = vsel %vm40_vm0, %v56_v13, 0.0  ;;  %p225_p5 = scmp.ne.s32.totalorder %s179_s2, %s224_s26  ;;  %p230_p7 = scmp.lt.s32.totalorder %s224_s26, %s224_s26 }
  0x15   :  { %v66_v19 = vadd.f32 %v65_v18, %v64_v15  ;;  %v113_v61 = vunpack.c.0.s8 %v112_v59 }
  0x16   :  { %62 = vadd.xlane.f32.xlu1 %v61_v16  ;;  %p231_p8 = por %p230_p7, %p229_p6 }
  0x17   :  { %v116_v2 = vsub.s32 %v113_v61, %v115_v62 }
  0x18   :  { %49 = vadd.xlane.f32.xlu0 %v48_v17  ;;  %p232_p9 = pnand %p231_p8, %p225_p5 }
  0x1a   :  { %67 = vadd.xlane.f32.xlu1 %v66_v19 }
  0x9d   :  { %v45_v21 = vpop.xlane.xlu0 %44 }
  0x9e   :  { %v69_v23 = vmul.f32 0.00390625, %v45_v21  ;;  %v77_v26 = vsel %vm40_vm0, %v45_v21, 0.0 }
  0x9f   :  { %v63_v22 = vpop.xlane.xlu1 %62 }
  0xa0   :  { %v73_v31 = vmul.f32 %v69_v23, %v69_v23  ;;  %v71_v32 = vmul.f32 0.00390625, %v63_v22  ;;  %v80_v33 = vsel %vm40_vm0, %v63_v22, 0.0 }
  0xa1   :  { %v50_v25 = vpop.xlane.xlu0 %49 }
  0xa2   :  { %v70_v27 = vmul.f32 0.00390625, %v50_v25  ;;  %v78_v28 = vsel %vm40_vm0, %v50_v25, 0.0  ;;  %v75_v43 = vsub.f32 %v71_v32, %v73_v31 }
  0xa3   :  { %v79_v29 = vadd.f32 %v78_v28, %v77_v26  ;;  %v68_v30 = vpop.xlane.xlu1 %67 }
  0xa4   :  { %v81_v34 = vsel %vm40_vm0, %v68_v30, 0.0  ;;  %v74_v35 = vmul.f32 %v70_v27, %v70_v27  ;;  %v72_v37 = vmul.f32 0.00390625, %v68_v30 }
  0xa5   :  { %v83_v36 = vmul.f32 0.001953125, %v79_v29  ;;  %v82_v38 = vadd.f32 %v81_v34, %v80_v33 }
  0xa6   :  { %v76_v44 = vsub.f32 %v72_v37, %v74_v35 }
  0xa7   :  { %v84_v39 = vmul.f32 0.001953125, %v82_v38  ;;  %v85_v40 = vmul.f32 %v83_v36, %v83_v36  ;;  %v92_v41 = vsel %vm88_vm1, %v83_v36, %v70_v27  ;;  %v91_v42 = vsel %vm88_vm1, %v83_v36, %v69_v23 }
  0xa8   :  { %109 = vperm.xlu1 %197, %v92_v41   ;;  %105 = vperm.xlu0 %196, %v91_v42  }
  0xa9   :  { %v86_v45 = vsub.f32 %v84_v39, %v85_v40 }
  0xab   :  { %v93_v46 = vsel %vm88_vm1, %v86_v45, %v75_v43  ;;  %v94_v47 = vsel %vm88_vm1, %v86_v45, %v76_v44 }
  0xac   :  { %v95_v48 = vmax.f32 %v93_v46, 0.0  ;;  %v96_v49 = vmax.f32 %v94_v47, 0.0 }
  0xae   :  { %v97_v50 = vadd.f32 1e-05, %v95_v48  ;;  %v98_v51 = vadd.f32 1e-05, %v96_v49 }
  0xb0   :  { %200 = vrsqrt.f32 %v97_v50 }
  0xb1   :  { %202 = vrsqrt.f32 %v98_v51 }
  0xbd   :  { %v201_v53 = vpop.eup %200 }
  0xbe   :  { %v129_v54 = vmul.f32 %v201_v53, %v101_v52  ;;  %v203_v55 = vpop.eup %202 }
  0xbf   :  { %v130_v56 = vmul.f32 %v203_v55, %v101_v52 }
  0xc0   :  { %133 = vperm.xlu1 %197, %v129_v54  }
  0xc4   :  { %137 = vperm.xlu1 %197, %v130_v56  }
  0xc8   :  { %159 = vperm.xlu1 %197, %v102_v57  }
 0x123   :  { %v110_v63 = vpop.permute.xlu1 %109  ;;  %v106_v3 = vpop.permute.xlu0 %105 }
 0x124   :  { %v124_v5 = vrot.slane %v110_v63, %v116_v2  ;;  %v117_v6 = vrot.slane %v106_v3, %v116_v2 }
 0x126   :  { %v128_v10 = vsub.f32 %v287_v1, %v124_v5  ;;  %v127_v11 = vsub.f32 %v285_v0, %v117_v6 }
 0x13b   :  { %v134_v4 = vpop.permute.xlu1 %133 }
 0x13c   :  { %v145_v8 = vrot.slane %v134_v4, %v116_v2 }
 0x13e   :  { %v155_v13 = vmul.f32 %v145_v8, %v127_v11 }
 0x13f   :  { %v138_v7 = vpop.permute.xlu1 %137 }
 0x140   :  { %v152_v9 = vrot.slane %v138_v7, %v116_v2 }
 0x142   :  { %v156_v14 = vmul.f32 %v152_v9, %v128_v10 }
 0x143   :  { %v160_v12 = vpop.permute.xlu1 %159 }
 0x144   :  { %v167_v15 = vrot.slane %v160_v12, %v116_v2 }
 0x146   :  { %v169_v16 = vadd.f32 %v167_v15, %v155_v13  ;;  %v170_v17 = vadd.f32 %v167_v15, %v156_v14 }
 0x148   :  { %171 = vst [vmem:[#allocation5] sm:$0xff] %v169_v16  ;;  %172 = vst [vmem:[#allocation5 + $0x8] sm:$0xff] %v170_v17 }
 0x149   :  { %235 = shalt.err (!%p232_p9)
}
 0x14a   :  { %184 = dma.vmem_to_hbm [thread:$0]  %s179_s2, 256, %s336_s4, [#allocation4], %s249_s18, %s249_s18, %s250_s19  }
 0x14b   :  { %246 = dma.done.wait [#allocation4], 256  }
 0x14c   :  { %247 = vsyncadd [#allocation4], 4294967040 }
 0x14d   :  { %188 = vsyncpa [#allocation3], 1 }
 0x14e   :  { %189 = vsyncpa [#allocation4], 1 }

</bundles_post_ra>
